<compile_context>
chip_gen: v7x
topology: tpu7x:2x2x1
jax: 0.10.0
libtpu: 0.0.40
codegen_flags: <defaults>
</compile_context>

<pallas_src>
import functools

import jax
import jax.numpy as jnp
from jax.experimental import pallas as pl
from jax.experimental.pallas import tpu as pltpu

LOG_STD_MIN = -20.0
LOG_STD_MAX = 2.0


def _round_up(x, m):
    return ((x + m - 1) // m) * m


def actor_forward_kernel(action_size,
                         x_ref,
                         w1_ref, b1_ref,
                         w2_ref, b2_ref,
                         wh_ref, bh_ref,
                         out_ref):
    """One batch tile: fc1+ReLU, fc2+ReLU, fused (mu|log_std|pad) head.

    Columns [0, A)         -> mu            (passed through)
    Columns [A, 2A)        -> log_std       (clamped to [LOG_STD_MIN, LOG_STD_MAX])
    Columns [2A, head_pad) -> zero padding  (sliced off in the wrapper)
    """
    # In-kernel cast to the MXU operand dtype (no-op for f32); keeps the HBM-side
    # input f32 so the wrapper never does a separate cast pass over `state`.
    x = x_ref[...].astype(w1_ref.dtype)

    # fc1 + ReLU (f32 accumulate / elementwise)
    h1 = jnp.dot(x, w1_ref[...], preferred_element_type=jnp.float32) + b1_ref[...]
    h1 = jnp.maximum(h1, 0.0)

    # fc2 + ReLU
    h2 = jnp.dot(h1.astype(w2_ref.dtype), w2_ref[...],
                 preferred_element_type=jnp.float32) + b2_ref[...]
    h2 = jnp.maximum(h2, 0.0)

    # fused head: one lane-dense matmul + store
    head = jnp.dot(h2.astype(wh_ref.dtype), wh_ref[...],
                   preferred_element_type=jnp.float32) + bh_ref[...]

    # clamp only the log_std columns; (1, head_pad) mask broadcasts over the batch tile
    col = jax.lax.broadcasted_iota(jnp.int32, (1, head.shape[1]), 1)
    is_log_std = (col >= action_size) & (col < 2 * action_size)
    out = jnp.where(is_log_std, jnp.clip(head, LOG_STD_MIN, LOG_STD_MAX), head)

    out_ref[...] = out.astype(out_ref.dtype)


def actor_forward(state, params, *, tile_b_max=4096, compute_dtype=jnp.float32,
                  out_dtype=jnp.bfloat16, min_grid=2):
    """Actor.forward as a single tiled Pallas call.

    state:  [B, state_size] float32
    params: dict with w1,b1,w2,b2,wmu,bmu,wls,bls ([in,out] weights, [1,out] biases)
    compute_dtype: MXU operand dtype (use bfloat16 on v6e/v7x; keep float32 on v5e)
    out_dtype:     dtype of the padded output slab written to HBM (bf16 halves writeback)
    returns (mu, log_std), each [B, action_size] float32
    """
    state = jnp.asarray(state, jnp.float32)
    B, state_size = state.shape
    hidden = params["w1"].shape[1]
    action_size = params["wmu"].shape[1]

    # ---- fuse + lane-pad the two heads (done once, outside the kernel) ----
    head_pad = _round_up(2 * action_size, 128)
    w_head = jnp.concatenate([params["wmu"], params["wls"]], axis=1)
    b_head = jnp.concatenate([params["bmu"], params["bls"]], axis=1)
    w_head = jnp.pad(w_head, ((0, 0), (0, head_pad - 2 * action_size)))
    b_head = jnp.pad(b_head, ((0, 0), (0, head_pad - 2 * action_size)))

    # ---- batch tiling (weights stay VMEM-resident across grid steps) ----
    # sublane alignment: 16 when a bf16 operand/output rides the batch axis, else 8
    sub = 16 if (out_dtype == jnp.bfloat16 or compute_dtype == jnp.bfloat16) else 8
    b_al = _round_up(max(B, 1), sub)
    tile_cap = max(sub, (int(tile_b_max) // sub) * sub)       # force multiple of `sub`
    num_tiles = pl.cdiv(b_al, tile_cap)
    if b_al >= min_grid * 128:                                # v7x: span both TCs
        num_tiles = max(num_tiles, min_grid)
    tile_b = _round_up(pl.cdiv(b_al, num_tiles), sub)         # balanced tiles
    num_tiles = pl.cdiv(b_al, tile_b)
    b_pad = num_tiles * tile_b

    state_in = state if b_pad == B else jnp.pad(state, ((0, b_pad - B), (0, 0)))

    # ---- optional bf16 MXU operands: cast only the tiny resident weights here ----
    w1, w2 = params["w1"], params["w2"]
    if compute_dtype != jnp.float32:
        w1 = w1.astype(compute_dtype)
        w2 = w2.astype(compute_dtype)
        w_head = w_head.astype(compute_dtype)
    b1, b2 = params["b1"], params["b2"]

    grid = (num_tiles,)

    fused = pl.pallas_call(
        functools.partial(actor_forward_kernel, action_size),
        out_shape=jax.ShapeDtypeStruct((b_pad, head_pad), out_dtype),
        grid=grid,
        in_specs=[
            pl.BlockSpec((tile_b, state_size), lambda i: (i, 0)),      # x tile
            pl.BlockSpec((state_size, hidden), lambda i: (0, 0)),      # w1 (resident)
            pl.BlockSpec((1, hidden), lambda i: (0, 0)),               # b1
            pl.BlockSpec((hidden, hidden), lambda i: (0, 0)),          # w2
            pl.BlockSpec((1, hidden), lambda i: (0, 0)),               # b2
            pl.BlockSpec((hidden, head_pad), lambda i: (0, 0)),        # fused head W
            pl.BlockSpec((1, head_pad), lambda i: (0, 0)),             # fused head b
        ],
        out_specs=pl.BlockSpec((tile_b, head_pad), lambda i: (i, 0)),
        compiler_params=pltpu.CompilerParams(
            dimension_semantics=("parallel",)),
    )(state_in, w1, b1, w2, b2, w_head, b_head)

    mu = fused[:B, :action_size].astype(jnp.float32)
    log_std = fused[:B, action_size:2 * action_size].astype(jnp.float32)
    return mu, log_std


def init_actor_params(key, state_size, action_size, hidden_size=32):
    """PyTorch nn.Linear-style init (U[-1/sqrt(fan_in), 1/sqrt(fan_in)]), [in,out] layout."""
    def linear(k, fan_in, fan_out):
        kw, kb = jax.random.split(k)
        bound = 1.0 / jnp.sqrt(jnp.float32(fan_in))
        w = jax.random.uniform(kw, (fan_in, fan_out), jnp.float32, -bound, bound)
        b = jax.random.uniform(kb, (1, fan_out), jnp.float32, -bound, bound)
        return w, b

    k1, k2, k3, k4 = jax.random.split(key, 4)
    w1, b1 = linear(k1, state_size, hidden_size)
    w2, b2 = linear(k2, hidden_size, hidden_size)
    wmu, bmu = linear(k3, hidden_size, action_size)
    wls, bls = linear(k4, hidden_size, action_size)
    return dict(w1=w1, b1=b1, w2=w2, b2=b2, wmu=wmu, bmu=bmu, wls=wls, bls=bls)


def actor_forward_ref(state, p):
    """Pure-JAX reference (matches PyTorch Actor.forward)."""
    h1 = jnp.maximum(state @ p["w1"] + p["b1"], 0.0)
    h2 = jnp.maximum(h1 @ p["w2"] + p["b2"], 0.0)
    mu = h2 @ p["wmu"] + p["bmu"]
    log_std = jnp.clip(h2 @ p["wls"] + p["bls"], LOG_STD_MIN, LOG_STD_MAX)
    return mu, log_std


if __name__ == "__main__":
    key = jax.random.PRNGKey(0)
    k_params, k_state, k_state2, k_state3 = jax.random.split(key, 4)

    state_size = 16
    action_size = 4
    hidden_size = 32
    params = init_actor_params(k_params, state_size, action_size, hidden_size)

    # --- small-batch check, default (bf16 output slab) path ---
    batch = 8
    state = jax.random.normal(k_state, (batch, state_size), jnp.float32)
    mu, log_std = actor_forward(state, params)
    mu = jax.block_until_ready(mu)
    log_std = jax.block_until_ready(log_std)
    mu_ref, ls_ref = actor_forward_ref(state, params)
    assert mu.shape == (batch, action_size) and log_std.shape == (batch, action_size)
    assert mu.dtype == jnp.float32 and log_std.dtype == jnp.float32
    assert jnp.allclose(mu, mu_ref, atol=2e-2, rtol=2e-2)
    assert jnp.allclose(log_std, ls_ref, atol=2e-2, rtol=2e-2)

    # --- exact f32-output path, single tile ---
    mu_e, ls_e = actor_forward(state, params, out_dtype=jnp.float32)
    mu_e = jax.block_until_ready(mu_e)
    ls_e = jax.block_until_ready(ls_e)
    assert jnp.allclose(mu_e, mu_ref, atol=1e-5, rtol=1e-5)
    assert jnp.allclose(ls_e, ls_ref, atol=1e-5, rtol=1e-5)

    # --- ragged batch, multi-tile balanced grid (f32 all the way, tight tolerance) ---
    batch2 = 200
    state2 = jax.random.normal(k_state2, (batch2, state_size), jnp.float32)
    mu2, ls2 = actor_forward(state2, params, tile_b_max=64, out_dtype=jnp.float32)
    mu2 = jax.block_until_ready(mu2)
    ls2 = jax.block_until_ready(ls2)
    mu2_ref, ls2_ref = actor_forward_ref(state2, params)
    assert mu2.shape == (batch2, action_size) and ls2.shape == (batch2, action_size)
    assert jnp.allclose(mu2, mu2_ref, atol=1e-5, rtol=1e-5)
    assert jnp.allclose(ls2, ls2_ref, atol=1e-5, rtol=1e-5)

    # --- larger batch exercising the >=2-tile (v7x two-TC) balanced split, defaults ---
    batch3 = 600
    state3 = jax.random.normal(k_state3, (batch3, state_size), jnp.float32)
    mu3, ls3 = actor_forward(state3, params)
    mu3 = jax.block_until_ready(mu3)
    ls3 = jax.block_until_ready(ls3)
    mu3_ref, ls3_ref = actor_forward_ref(state3, params)
    assert jnp.allclose(mu3, mu3_ref, atol=2e-2, rtol=2e-2)
    assert jnp.allclose(ls3, ls3_ref, atol=2e-2, rtol=2e-2)

    # --- bf16 MXU-operand path (v6e/v7x; in-kernel input cast), loosest tolerance ---
    mu4, ls4 = actor_forward(state2, params, tile_b_max=64, compute_dtype=jnp.bfloat16)
    mu4 = jax.block_until_ready(mu4)
    ls4 = jax.block_until_ready(ls4)
    assert jnp.allclose(mu4, mu2_ref, atol=5e-2, rtol=5e-2)
    assert jnp.allclose(ls4, ls2_ref, atol=5e-2, rtol=5e-2)

    # TODO(synk): evaluate/get_action (Normal.rsample + tanh squash + log_prob) need RNG;
    # they could be fused in-kernel via pltpu.prng_seed/prng_random_bits, but only the
    # module's forward() is implemented here.
    print("KERNEL_OK")
</pallas_src>

<mosaic_0001>
module attributes {stable_mosaic.version = 11 : i64} {
  func.func @actor_forward_kernel(%arg0: i32, %arg1: memref<16x16xf32, #tpu.memory_space<vmem>>, %arg2: memref<16x32xf32, #tpu.memory_space<vmem>>, %arg3: memref<1x32xf32, #tpu.memory_space<vmem>>, %arg4: memref<32x32xf32, #tpu.memory_space<vmem>>, %arg5: memref<1x32xf32, #tpu.memory_space<vmem>>, %arg6: memref<32x128xf32, #tpu.memory_space<vmem>>, %arg7: memref<1x128xf32, #tpu.memory_space<vmem>>, %arg8: memref<16x128xbf16, #tpu.memory_space<vmem>>) attributes {dimension_semantics = [#tpu.dimension_semantics<parallel>], iteration_bounds = array<i64: 1>, scalar_prefetch = 0 : i64, scratch_operands = 0 : i64, tpu.core_type = #tpu.core_type<tc>, window_params = [{transform_indices = @transform_0, window_bounds = array<i64: 16, 16>}, {pipeline_mode = #tpu.pipeline_mode<synchronous>, transform_indices = @transform_1, window_bounds = array<i64: 16, 32>}, {pipeline_mode = #tpu.pipeline_mode<synchronous>, transform_indices = @transform_2, window_bounds = array<i64: 1, 32>}, {pipeline_mode = #tpu.pipeline_mode<synchronous>, transform_indices = @transform_3, window_bounds = array<i64: 32, 32>}, {pipeline_mode = #tpu.pipeline_mode<synchronous>, transform_indices = @transform_4, window_bounds = array<i64: 1, 32>}, {pipeline_mode = #tpu.pipeline_mode<synchronous>, transform_indices = @transform_5, window_bounds = array<i64: 32, 128>}, {pipeline_mode = #tpu.pipeline_mode<synchronous>, transform_indices = @transform_6, window_bounds = array<i64: 1, 128>}, {transform_indices = @transform_7, window_bounds = array<i64: 16, 128>}]} {
    %c0 = arith.constant 0 : index
    %c0_0 = arith.constant 0 : index
    %0 = vector.load %arg1[%c0, %c0_0] : memref<16x16xf32, #tpu.memory_space<vmem>>, vector<16x16xf32>
    %c0_1 = arith.constant 0 : index
    %c0_2 = arith.constant 0 : index
    %1 = vector.load %arg2[%c0_1, %c0_2] : memref<16x32xf32, #tpu.memory_space<vmem>>, vector<16x32xf32>
    %cst = arith.constant dense<0.000000e+00> : vector<16x32xf32>
    %2 = tpu.matmul %0, %1, %cst {dimension_numbers = #tpu.dot_dimension_numbers<[1], [0], [0], [1], [0, 0, 1, 1], [], []>} : vector<16x16xf32>, vector<16x32xf32>, vector<16x32xf32> -> vector<16x32xf32>
    %c0_3 = arith.constant 0 : index
    %c0_4 = arith.constant 0 : index
    %3 = vector.load %arg3[%c0_3, %c0_4] : memref<1x32xf32, #tpu.memory_space<vmem>>, vector<1x32xf32>
    %4 = vector.broadcast %3 : vector<1x32xf32> to vector<16x32xf32>
    %5 = arith.addf %2, %4 : vector<16x32xf32>
    %cst_5 = arith.constant 0.000000e+00 : f32
    %6 = vector.broadcast %cst_5 : f32 to vector<16x32xf32>
    %7 = arith.maximumf %5, %6 : vector<16x32xf32>
    %c0_6 = arith.constant 0 : index
    %c0_7 = arith.constant 0 : index
    %8 = vector.load %arg4[%c0_6, %c0_7] : memref<32x32xf32, #tpu.memory_space<vmem>>, vector<32x32xf32>
    %cst_8 = arith.constant dense<0.000000e+00> : vector<16x32xf32>
    %9 = tpu.matmul %7, %8, %cst_8 {dimension_numbers = #tpu.dot_dimension_numbers<[1], [0], [0], [1], [0, 0, 1, 1], [], []>} : vector<16x32xf32>, vector<32x32xf32>, vector<16x32xf32> -> vector<16x32xf32>
    %c0_9 = arith.constant 0 : index
    %c0_10 = arith.constant 0 : index
    %10 = vector.load %arg5[%c0_9, %c0_10] : memref<1x32xf32, #tpu.memory_space<vmem>>, vector<1x32xf32>
    %11 = vector.broadcast %10 : vector<1x32xf32> to vector<16x32xf32>
    %12 = arith.addf %9, %11 : vector<16x32xf32>
    %cst_11 = arith.constant 0.000000e+00 : f32
    %13 = vector.broadcast %cst_11 : f32 to vector<16x32xf32>
    %14 = arith.maximumf %12, %13 : vector<16x32xf32>
    %c0_12 = arith.constant 0 : index
    %c0_13 = arith.constant 0 : index
    %15 = vector.load %arg6[%c0_12, %c0_13] : memref<32x128xf32, #tpu.memory_space<vmem>>, vector<32x128xf32>
    %cst_14 = arith.constant dense<0.000000e+00> : vector<16x128xf32>
    %16 = tpu.matmul %14, %15, %cst_14 {dimension_numbers = #tpu.dot_dimension_numbers<[1], [0], [0], [1], [0, 0, 1, 1], [], []>} : vector<16x32xf32>, vector<32x128xf32>, vector<16x128xf32> -> vector<16x128xf32>
    %c0_15 = arith.constant 0 : index
    %c0_16 = arith.constant 0 : index
    %17 = vector.load %arg7[%c0_15, %c0_16] : memref<1x128xf32, #tpu.memory_space<vmem>>, vector<1x128xf32>
    %18 = vector.broadcast %17 : vector<1x128xf32> to vector<16x128xf32>
    %19 = arith.addf %16, %18 : vector<16x128xf32>
    %20 = tpu.iota {dimensions = array<i32: 1>} : vector<1x128xi32>
    %c4_i32 = arith.constant 4 : i32
    %21 = vector.broadcast %c4_i32 : i32 to vector<1x128xi32>
    %22 = arith.cmpi sge, %20, %21 : vector<1x128xi32>
    %c8_i32 = arith.constant 8 : i32
    %23 = vector.broadcast %c8_i32 : i32 to vector<1x128xi32>
    %24 = arith.cmpi slt, %20, %23 : vector<1x128xi32>
    %25 = arith.andi %22, %24 : vector<1x128xi1>
    %cst_17 = arith.constant -2.000000e+01 : f32
    %cst_18 = arith.constant 2.000000e+00 : f32
    %26 = vector.broadcast %cst_17 : f32 to vector<16x128xf32>
    %27 = arith.maximumf %26, %19 : vector<16x128xf32>
    %28 = vector.broadcast %cst_18 : f32 to vector<16x128xf32>
    %29 = arith.minimumf %28, %27 : vector<16x128xf32>
    %30 = vector.shape_cast %25 : vector<1x128xi1> to vector<1x128xi1>
    %31 = vector.broadcast %30 : vector<1x128xi1> to vector<16x128xi1>
    %32 = arith.select %31, %29, %19 : vector<16x128xi1>, vector<16x128xf32>
    %33 = arith.truncf %32 : vector<16x128xf32> to vector<16x128xbf16>
    %c0_19 = arith.constant 0 : index
    %c0_20 = arith.constant 0 : index
    %34 = vector.load %arg8[%c0_19, %c0_20] : memref<16x128xbf16, #tpu.memory_space<vmem>>, vector<16x128xbf16>
    tpu.vector_store %arg8[%c0_19, %c0_20], %33 {strides = array<i32>} : memref<16x128xbf16, #tpu.memory_space<vmem>>, vector<16x128xbf16>,
    return
  }
  func.func @transform_0(%arg0: i32) -> (i32, i32) {
    %c0_i32 = arith.constant 0 : i32
    %c0_i32_0 = arith.constant 0 : i32
    return %arg0, %c0_i32 : i32, i32
  }
  func.func @transform_1(%arg0: i32) -> (i32, i32) {
    %c0_i32 = arith.constant 0 : i32
    %c0_i32_0 = arith.constant 0 : i32
    %c0_i32_1 = arith.constant 0 : i32
    return %c0_i32, %c0_i32_0 : i32, i32
  }
  func.func @transform_2(%arg0: i32) -> (i32, i32) {
    %c0_i32 = arith.constant 0 : i32
    %c0_i32_0 = arith.constant 0 : i32
    %c0_i32_1 = arith.constant 0 : i32
    return %c0_i32, %c0_i32_0 : i32, i32
  }
  func.func @transform_3(%arg0: i32) -> (i32, i32) {
    %c0_i32 = arith.constant 0 : i32
    %c0_i32_0 = arith.constant 0 : i32
    %c0_i32_1 = arith.constant 0 : i32
    return %c0_i32, %c0_i32_0 : i32, i32
  }
  func.func @transform_4(%arg0: i32) -> (i32, i32) {
    %c0_i32 = arith.constant 0 : i32
    %c0_i32_0 = arith.constant 0 : i32
    %c0_i32_1 = arith.constant 0 : i32
    return %c0_i32, %c0_i32_0 : i32, i32
  }
  func.func @transform_5(%arg0: i32) -> (i32, i32) {
    %c0_i32 = arith.constant 0 : i32
    %c0_i32_0 = arith.constant 0 : i32
    %c0_i32_1 = arith.constant 0 : i32
    return %c0_i32, %c0_i32_0 : i32, i32
  }
  func.func @transform_6(%arg0: i32) -> (i32, i32) {
    %c0_i32 = arith.constant 0 : i32
    %c0_i32_0 = arith.constant 0 : i32
    %c0_i32_1 = arith.constant 0 : i32
    return %c0_i32, %c0_i32_0 : i32, i32
  }
  func.func @transform_7(%arg0: i32) -> (i32, i32) {
    %c0_i32 = arith.constant 0 : i32
    %c0_i32_0 = arith.constant 0 : i32
    return %arg0, %c0_i32 : i32, i32
  }
}

</mosaic_0001>

<bundles_post_ra>
// kernel: tpu_custom_call.1
= control target key start
LH: loop header
LB: loop body
LE: loop exit
PB: predicated region body
PF: predicated region fallthrough
CT: control target
= control target key end

     0   :  { %12 = vsyncpa [#allocation3], 0  ;;  %s764_s0 = inlined_call_operand.hbm [shape: f32[16,16], index: 0, kind: input, shape index: {}]   ;;  %s765_s1 = inlined_call_operand.hbm [shape: f32[16,32], index: 1, kind: input, shape index: {}]   ;;  %s766_s2 = inlined_call_operand.vmem [shape: f32[1,32], index: 2, kind: input, shape index: {}]   ;;  %s767_s3 = inlined_call_operand.hbm [shape: f32[32,32], index: 3, kind: input, shape index: {}]   ;;  %s768_s4 = inlined_call_operand.vmem [shape: f32[1,32], index: 4, kind: input, shape index: {}]   ;;  %s769_s5 = inlined_call_operand.hbm [shape: f32[32,128], index: 5, kind: input, shape index: {}]   ;;  %s770_s6 = inlined_call_operand.vmem [shape: f32[1,128], index: 6, kind: input, shape index: {}]   ;;  %s771_s7 = inlined_call_operand.hbm [shape: bf16[16,128], index: 7, kind: output, shape index: {}]  }
   0x1   :  { %13 = vsyncpa [#allocation6], 0 }
   0x2   :  { %14 = vsyncpa [#allocation9], 0 }
   0x3   :  { %15 = vsyncpa [#allocation4], 0  ;;  %s616_s24 = smov [#allocation5]   ;;  %s617_s26 = smov [#allocation2]  }
   0x4   :  { %s33_s25 = sshll.u32 %s616_s24, 4  ;;  %s21_s27 = sshll.u32 %s617_s26, 4  ;;  %s34_s25 = int_to_ptr.vmem [resolvable:$true] %s33_s25  ;;  %s665_s27 = int_to_ptr.vmem [resolvable:$true] %s21_s27 }
   0x5   :  { %s498_s30 = scalar_lea.hbm %s765_s1, 256 }
   0x6   :  { %p499_p0 = scmp.ne.s32.totalorder %s765_s1, %s498_s30  ;;  %p502_p1 = scmp.lt.u32.totalorder %s498_s30, %s765_s1 }
   0x8   :  { %p504_p2 = pnand %p502_p1, %p499_p0 }
   0xa   :  { %507 = shalt.err (!%p504_p2)
}
   0xb   :  { %s508_s12 = scalar_lea.vmem %s34_s25, 256  ;;  %p513_p4 = scmp.lt.s32.totalorder %s34_s25, %s34_s25 }
   0xc   :  { %p509_p3 = scmp.ne.s32.totalorder %s34_s25, %s508_s12  ;;  %p514_p5 = scmp.lt.s32.totalorder %s508_s12, %s508_s12 }
   0xe   :  { %p515_p6 = por %p514_p5, %p513_p4 }
  0x10   :  { %p516_p7 = pnand %p515_p6, %p509_p3 }
  0x12   :  { %519 = shalt.err (!%p516_p7)
}
  0x13   :  { %s618_s13 = smov 128   ;;  %s619_s14 = smov 8  }
  0x14   :  { %39 = dma.hbm_to_vmem [thread:$0]  %s765_s1, 256, %s34_s25, [#allocation6], %s618_s13, %s618_s13, %s619_s14  }
  0x15   :  { %s520_s19 = scalar_lea.hbm %s764_s0, 256 }
  0x16   :  { %p521_p8 = scmp.ne.s32.totalorder %s764_s0, %s520_s19  ;;  %p524_p9 = scmp.lt.u32.totalorder %s520_s19, %s764_s0 }
  0x18   :  { %p526_p10 = pnand %p524_p9, %p521_p8 }
  0x1a   :  { %529 = shalt.err (!%p526_p10)
}
  0x1b   :  { %s530_s24 = scalar_lea.vmem %s665_s27, 256  ;;  %p535_p12 = scmp.lt.s32.totalorder %s665_s27, %s665_s27 }
  0x1c   :  { %p531_p11 = scmp.ne.s32.totalorder %s665_s27, %s530_s24  ;;  %p536_p13 = scmp.lt.s32.totalorder %s530_s24, %s530_s24 }
  0x1e   :  { %p537_p0 = por %p536_p13, %p535_p12 }
  0x20   :  { %p538_p1 = pnand %p537_p0, %p531_p11 }
  0x22   :  { %541 = shalt.err (!%p538_p1)
}
  0x23   :  { %27 = dma.hbm_to_vmem [thread:$0]  %s764_s0, 256, %s665_s27, [#allocation3], %s618_s13, %s618_s13, %s619_s14  }
  0x24   :  { %s620_s26 = smov [#allocation7]   ;;  %s621_s29 = smov [#allocation8]  }
  0x25   :  { %s47_s28 = sshll.u32 %s620_s26, 4  ;;  %s61_s30 = sshll.u32 %s621_s29, 4  ;;  %s48_s28 = int_to_ptr.vmem [resolvable:$true] %s47_s28  ;;  %s702_s30 = int_to_ptr.vmem [resolvable:$true] %s61_s30 }
  0x26   :  { %s542_s10 = scalar_lea.hbm %s767_s3, 512 }
  0x27   :  { %p543_p2 = scmp.ne.s32.totalorder %s767_s3, %s542_s10  ;;  %p546_p3 = scmp.lt.u32.totalorder %s542_s10, %s767_s3 }
  0x29   :  { %p548_p4 = pnand %p546_p3, %p543_p2 }
  0x2b   :  { %551 = shalt.err (!%p548_p4)
}
  0x2c   :  { %s552_s0 = scalar_lea.vmem %s48_s28, 512  ;;  %p557_p6 = scmp.lt.s32.totalorder %s48_s28, %s48_s28 }
  0x2d   :  { %p553_p5 = scmp.ne.s32.totalorder %s48_s28, %s552_s0  ;;  %p558_p7 = scmp.lt.s32.totalorder %s552_s0, %s552_s0 }
  0x2f   :  { %p559_p8 = por %p558_p7, %p557_p6 }
  0x31   :  { %p560_p9 = pnand %p559_p8, %p553_p5 }
  0x33   :  { %563 = shalt.err (!%p560_p9)
}
  0x34   :  { %53 = dma.hbm_to_vmem [thread:$0]  %s767_s3, 512, %s48_s28, [#allocation6], %s618_s13, %s618_s13, %s619_s14  }
  0x35   :  { %s564_s20 = scalar_lea.hbm %s769_s5, 512 }
  0x36   :  { %p565_p10 = scmp.ne.s32.totalorder %s769_s5, %s564_s20  ;;  %p568_p11 = scmp.lt.u32.totalorder %s564_s20, %s769_s5 }
  0x38   :  { %p570_p12 = pnand %p568_p11, %p565_p10 }
  0x3a   :  { %573 = shalt.err (!%p570_p12)
}
  0x3b   :  { %s574_s1 = scalar_lea.vmem %s702_s30, 512  ;;  %p579_p0 = scmp.lt.s32.totalorder %s702_s30, %s702_s30 }
  0x3c   :  { %p575_p13 = scmp.ne.s32.totalorder %s702_s30, %s574_s1  ;;  %p580_p1 = scmp.lt.s32.totalorder %s574_s1, %s574_s1 }
  0x3e   :  { %p581_p2 = por %p580_p1, %p579_p0 }
  0x40   :  { %p582_p3 = pnand %p581_p2, %p575_p13 }
  0x42   :  { %585 = shalt.err (!%p582_p3)
}
  0x43   :  { %67 = dma.hbm_to_vmem [thread:$0]  %s769_s5, 512, %s702_s30, [#allocation9], %s618_s13, %s618_s13, %s619_s14  }
  0x44   :  { %608 = dma.done.wait [#allocation3], 256  }
  0x45   :  { %609 = vsyncadd [#allocation3], 4294967040 }
  0x46   :  { %610 = dma.done.wait [#allocation6], 768  }
  0x47   :  { %611 = vsyncadd [#allocation6], 4294966528 }
  0x48   :  { %612 = dma.done.wait [#allocation9], 512  }
  0x49   :  { %613 = vsyncadd [#allocation9], 4294966784  ;;  %vm93_vm0 = vcmask 130048   ;;  %v84_v0 = vld [vmem:[#allocation5] sm:$0xff]  ;;  %v85_v1 = vld [vmem:[#allocation5 + $0x8] sm:$0xff]  ;;  %vm188_vm1 = vcmask 261120   ;;  %v364_v31 = vlaneseq }
  0x4a   :  { %v82_v2 = vld [vmem:[#allocation2] sm:$0xff]  ;;  %v469_v3 = vpack.c.bf16 %v85_v1, %v84_v0  ;;  %v178_v5 = vld [vmem:[#allocation7 + $0x8] sm:$0xff]  ;;  %v179_v8 = vld [vmem:[#allocation7 + $0x10] sm:$0xff] }
  0x4b   :  { %444 = vmatprep.mubr.msk.f32.mxu0 %vm93_vm0, %v82_v2  ;;  %v177_v4 = vld [vmem:[#allocation7] sm:$0xff]  ;;  %v83_v7 = vld [vmem:[#allocation2 + $0x8] sm:$0xff]  ;;  %v180_v9 = vld [vmem:[#allocation7 + $0x18] sm:$0xff]  ;;  %v365_v32 = vand.u32 127, %v364_v31 }
  0x4c   :  { %v473_v6 = vpack.c.bf16 %v178_v5, %v177_v4  ;;  %470 = vmatprep.subr.bf16.mxu0 %v469_v3  ;;  %v477_v10 = vpack.c.bf16 %v180_v9, %v179_v8  ;;  %v272_v11 = vld [vmem:[#allocation8] sm:$0xff]  ;;  %v273_v12 = vld [vmem:[#allocation8 + $0x8] sm:$0xff]  ;;  %v274_v21 = vld [vmem:[#allocation8 + $0x10] sm:$0xff] }
  0x4d   :  { %472 = vmatpush3.bf16.msra.mxu0 %v469_v3  ;;  %v481_v13 = vpack.c.bf16 %v273_v12, %v272_v11  ;;  %v406_v14 = vld [vmem:[%s766_s2] ss:$0 sm:$0xff]  ;;  %v275_v22 = vld [vmem:[#allocation8 + $0x18] sm:$0xff]  ;;  %vm366_vm2 = vcmp.ge.s32.totalorder %v365_v32, 4  ;;  %vm367_vm3 = vcmp.lt.s32.totalorder %v365_v32, 8 }
  0x4e   :  { %474 = vmatprep.subr.bf16.mxu1 %v473_v6  ;;  %v485_v23 = vpack.c.bf16 %v275_v22, %v274_v21  ;;  %v409_v24 = vld [vmem:[%s768_s4] ss:$0 sm:$0xff]  ;;  %vm368_vm4 = vmand %vm366_vm2, %vm367_vm3  ;;  %s622_s4 = smov [#allocation10]  }
  0x4f   :  { %476 = vmatpush3.bf16.msra.mxu1 %v473_v6  ;;  %482 = vmatprep.subr.bf16.mxu0 %v481_v13  ;;  %v412_v33 = vld [vmem:[%s770_s6] ss:$0 sm:$0xff]  ;;  %s392_s29 = sshll.u32 %s622_s4, 4  ;;  %s393_s29 = int_to_ptr.vmem [resolvable:$true] %s392_s29 }
  0x50   :  { %445 = vmatmul.mubr.msk.f32.vlgmr.msra.gmra.mrb[0].mxu0 %vm93_vm0, %v83_v7  ;;  %478 = vmatprep.subr.bf16.mxu1 %v477_v10  ;;  %s586_s30 = scalar_lea.vmem %s393_s29, 128  ;;  %p591_p5 = scmp.lt.s32.totalorder %s393_s29, %s393_s29 }
  0x51   :  { %484 = vmatpush3.bf16.msra.mxu0 %v481_v13  ;;  %p587_p4 = scmp.ne.s32.totalorder %s393_s29, %s586_s30  ;;  %p592_p6 = scmp.lt.s32.totalorder %s586_s30, %s586_s30 }
  0x52   :  { %486 = vmatprep.subr.bf16.mxu0 %v485_v23 }
  0x53   :  { %480 = vmatpush3.bf16.msra.mxu1 %v477_v10  ;;  %p593_p7 = por %p592_p6, %p591_p5 }
  0x55   :  { %488 = vmatpush3.bf16.msra.mxu0 %v485_v23  ;;  %p594_p8 = pnand %p593_p7, %p587_p4 }
 0x123   :  { %v446_v15 = vpop.f32.mrb[0].mxu0 }
 0x124   :  { %v172_v16 = vadd.f32 %v446_v15, %v406_v14  ;;  %v166_v17 = vpop.f32.mrb[1].mxu0 }
 0x125   :  { %v167_v18 = vadd.f32 %v406_v14, %v166_v17 }
 0x126   :  { %v176_v20 = vmax.f32 %v172_v16, 0.0 }
 0x127   :  { %v175_v19 = vmax.f32 %v167_v18, 0.0 }
 0x129   :  { %455 = vmatprep.mubr.msk.f32.mxu1 %vm188_vm1, %v175_v19 }
 0x12a   :  { %456 = vmatmul.mubr.msk.f32.vlgmr.msra.gmra.mrb[0].mxu1 %vm188_vm1, %v176_v20 }
 0x1fd   :  { %v457_v25 = vpop.f32.mrb[0].mxu1 }
 0x1fe   :  { %v267_v26 = vadd.f32 %v457_v25, %v409_v24  ;;  %v261_v27 = vpop.f32.mrb[1].mxu1 }
 0x1ff   :  { %v262_v28 = vadd.f32 %v409_v24, %v261_v27 }
 0x200   :  { %v271_v30 = vmax.f32 %v267_v26, 0.0 }
 0x201   :  { %v270_v29 = vmax.f32 %v262_v28, 0.0 }
 0x203   :  { %466 = vmatprep.mubr.msk.f32.mxu0 %vm188_vm1, %v270_v29 }
 0x204   :  { %467 = vmatmul.mubr.msk.f32.vlgmr.msra.gmra.mrb[2].mxu0 %vm188_vm1, %v271_v30 }
 0x2d7   :  { %v468_v34 = vpop.f32.mrb[2].mxu0 }
 0x2d8   :  { %v361_v35 = vadd.f32 %v468_v34, %v412_v33  ;;  %v355_v36 = vpop.f32.mrb[3].mxu0 }
 0x2d9   :  { %v356_v37 = vadd.f32 %v412_v33, %v355_v36 }
 0x2da   :  { %v370_v38 = vmax.f32 %v361_v35, -20.0 }
 0x2db   :  { %v369_v39 = vmax.f32 %v356_v37, -20.0 }
 0x2dc   :  { %v372_v40 = vmin.f32 %v370_v38, 2.0 }
 0x2dd   :  { %v371_v41 = vmin.f32 %v369_v39, 2.0 }
 0x2de   :  { %v376_v42 = vsel %vm368_vm4, %v372_v40, %v361_v35 }
 0x2df   :  { %v375_v43 = vsel %vm368_vm4, %v371_v41, %v356_v37 }
 0x2e0   :  { %v422_v44 = vpack.c.bf16 %v376_v42, %v375_v43 }
 0x2e2   :  { %423 = vst [vmem:[#allocation10] sm:$0xff] %v422_v44  }
 0x2e3   :  { %597 = shalt.err (!%p594_p8)
}
 0x2e4   :  { %s598_s9 = scalar_lea.hbm %s771_s7, 128 }
 0x2e5   :  { %p599_p9 = scmp.ne.s32.totalorder %s771_s7, %s598_s9  ;;  %p602_p10 = scmp.lt.u32.totalorder %s598_s9, %s771_s7 }
 0x2e7   :  { %p604_p11 = pnand %p602_p10, %p599_p9 }
 0x2e9   :  { %607 = shalt.err (!%p604_p11)
}
 0x2ea   :  { %s623_s16 = smov 64   ;;  %s624_s0 = smov 4  }
 0x2eb   :  { %398 = dma.vmem_to_hbm [thread:$0]  %s393_s29, 128, %s771_s7, [#allocation4], %s623_s16, %s623_s16, %s624_s0  }
 0x2ec   :  { %614 = dma.done.wait [#allocation4], 128  }
 0x2ed   :  { %615 = vsyncadd [#allocation4], 4294967168 }
 0x2ee   :  { %402 = vsyncpa [#allocation3], 1 }
 0x2ef   :  { %403 = vsyncpa [#allocation6], 1 }
 0x2f0   :  { %404 = vsyncpa [#allocation9], 1 }
 0x2f1   :  { %405 = vsyncpa [#allocation4], 1 }

</bundles_post_ra>
